<compile_context>
chip_gen: v7x
topology: tpu7x:2x2x1
jax: 0.10.0
libtpu: 0.0.40
codegen_flags: <defaults>
</compile_context>

<pallas_src>
import functools

import numpy as np
import jax
import jax.numpy as jnp
from jax import lax
from jax.experimental import pallas as pl
from jax.experimental.pallas import tpu as pltpu

BETA = 0.7
ALPHA = 1.0 - BETA  # matches the python-float 1.0 - 0.7 of the torch module


def _finalize(out_ref, tp, sp, sr):
    """tp/sp/sr: (TB, 1) totals -> out_ref[0] = lane-broadcast (1 - tversky)."""
    fp = sp - tp                       # = sum((1-ref)*prob)
    fn = sr - tp                       # = sum(ref*(1-prob))
    tversky = tp / (tp + jnp.float32(ALPHA) * fp + jnp.float32(BETA) * fn)
    out_ref[0] = jnp.broadcast_to(jnp.float32(1.0) - tversky,
                                  (out_ref.shape[1], out_ref.shape[2]))


def _tversky_kernel_aligned(prob_ref, ref_ref, out_ref, acc_ref, *,
                            rows_total, rows_chunk, need_mask):
    """C*H*W % 128 == 0 path.

    prob_ref/ref_ref : (1, TB, rows_chunk, 128) chunk of TB samples.
    out_ref          : (1, TB, 128) per-sample (1 - tversky), lane-broadcast.
    acc_ref          : VMEM (3, TB, 128) running [sum(r*p), sum(p), sum(r)].
    """
    j = pl.program_id(1)
    last = pl.num_programs(1) - 1

    @pl.when(j == 0)
    def _():
        acc_ref[...] = jnp.zeros_like(acc_ref)

    def accumulate(p, r):
        # Sublane-axis partial reductions -> (TB, 128) lane vectors.
        # TODO(synk): if a v7x profile ever shows the VALU slot saturating
        # (bf16 inputs), these row-sums can be offloaded to the MXU via an
        # ones-matrix jnp.dot; not worth the complexity on v5e/v6e.
        acc_ref[0] = acc_ref[0] + jnp.sum(r * p, axis=1)
        acc_ref[1] = acc_ref[1] + jnp.sum(p, axis=1)
        acc_ref[2] = acc_ref[2] + jnp.sum(r, axis=1)

    if need_mask:
        @pl.when(j != last)
        def _():
            accumulate(prob_ref[0].astype(jnp.float32),
                       ref_ref[0].astype(jnp.float32))

        @pl.when(j == last)
        def _():
            # Last chunk overhangs the row axis: zero BOTH operands past
            # rows_total so no unspecified data corrupts the sums.
            p = prob_ref[0].astype(jnp.float32)
            r = ref_ref[0].astype(jnp.float32)
            row = j * rows_chunk + lax.broadcasted_iota(jnp.int32, p.shape, 1)
            valid = row < rows_total
            accumulate(jnp.where(valid, p, 0.0), jnp.where(valid, r, 0.0))
    else:
        accumulate(prob_ref[0].astype(jnp.float32),
                   ref_ref[0].astype(jnp.float32))

    @pl.when(j == last)
    def _():
        tp = jnp.sum(acc_ref[0], axis=-1, keepdims=True)   # (TB, 1)
        sp = jnp.sum(acc_ref[1], axis=-1, keepdims=True)
        sr = jnp.sum(acc_ref[2], axis=-1, keepdims=True)
        _finalize(out_ref, tp, sp, sr)


def _tversky_kernel_flat(prob_ref, ref_ref, out_ref, acc_ref, *,
                         n_valid, chunk_elems, need_mask):
    """C*H*W % 128 != 0 path: stream flat (TB, chunk_elems) blocks, no HBM pad.

    prob_ref/ref_ref : (1, TB, chunk_elems).
    out_ref          : (1, TB, 128).
    acc_ref          : VMEM (3, TB, 1) running [sum(r*p), sum(p), sum(r)].
    """
    j = pl.program_id(1)
    last = pl.num_programs(1) - 1

    @pl.when(j == 0)
    def _():
        acc_ref[...] = jnp.zeros_like(acc_ref)

    def accumulate(p, r):
        acc_ref[0] = acc_ref[0] + jnp.sum(r * p, axis=-1, keepdims=True)
        acc_ref[1] = acc_ref[1] + jnp.sum(p, axis=-1, keepdims=True)
        acc_ref[2] = acc_ref[2] + jnp.sum(r, axis=-1, keepdims=True)

    if need_mask:
        @pl.when(j != last)
        def _():
            accumulate(prob_ref[0].astype(jnp.float32),
                       ref_ref[0].astype(jnp.float32))

        @pl.when(j == last)
        def _():
            p = prob_ref[0].astype(jnp.float32)
            r = ref_ref[0].astype(jnp.float32)
            elem = j * chunk_elems + lax.broadcasted_iota(jnp.int32, p.shape, 1)
            valid = elem < n_valid
            accumulate(jnp.where(valid, p, 0.0), jnp.where(valid, r, 0.0))
    else:
        accumulate(prob_ref[0].astype(jnp.float32),
                   ref_ref[0].astype(jnp.float32))

    @pl.when(j == last)
    def _():
        _finalize(out_ref, acc_ref[0], acc_ref[1], acc_ref[2])


def tversky_loss(outputs, target, *, block_bytes=2 << 20):
    """outputs: tuple whose element 0 has the same shape as target (B, C, H, W)."""
    prob = outputs[0]
    assert prob.shape == target.shape, (prob.shape, target.shape)
    b = target.shape[0]
    n = int(np.prod(target.shape[1:]))

    # Samples per grid row: keep the parallel axis length >= 2 whenever B >= 2
    # so v7x's second TensorCore always gets work (no effect on v5e/v6e).
    tb = 1
    for cand in (8, 4, 2, 1):
        if b % cand == 0 and b // cand >= 2:
            tb = cand
            break
    g = b // tb

    itemsize_p = jnp.dtype(prob.dtype).itemsize
    itemsize_r = jnp.dtype(target.dtype).itemsize
    # Sublane multiple of the narrower dtype: 8 (f32), 16 (bf16), 32 (int8).
    min_item = max(1, min(itemsize_p, itemsize_r, 4))
    sub_mult = 8 * (4 // min_item)
    # ~block_bytes per input block (sized by the wider dtype): with the 2 MiB
    # default, 2 inputs x 2 pipeline buffers = 8 MiB of pipelined VMEM.
    bytes_per_row = tb * 128 * max(itemsize_p, itemsize_r)
    rows_budget = max(sub_mult, block_bytes // bytes_per_row)

    if n % 128 == 0:
        # Free bitcast reshape to (G, TB, rows, 128); sublane-axis reductions.
        rows_total = n // 128
        if rows_total <= rows_budget:
            rows_chunk = rows_total            # full-extent block, always legal
        else:
            rows_chunk = (rows_budget // sub_mult) * sub_mult
        n_chunks = -(-rows_total // rows_chunk)
        need_mask = (rows_total % rows_chunk) != 0

        prob_r = prob.reshape(g, tb, rows_total, 128)
        ref_r = target.reshape(g, tb, rows_total, 128)

        kernel = functools.partial(_tversky_kernel_aligned,
                                   rows_total=rows_total,
                                   rows_chunk=rows_chunk,
                                   need_mask=need_mask)
        in_spec = pl.BlockSpec((1, tb, rows_chunk, 128), lambda i, j: (i, 0, j, 0))
        acc_shape = pltpu.VMEM((3, tb, 128), jnp.float32)
    else:
        # No jnp.pad HBM round-trip: stream flat rows, mask the tail in-kernel.
        if n <= rows_budget * 128:
            chunk_elems = n                    # full-extent block, always legal
        else:
            chunk_elems = (rows_budget // sub_mult) * sub_mult * 128
        n_chunks = -(-n // chunk_elems)
        need_mask = (n % chunk_elems) != 0

        prob_r = prob.reshape(g, tb, n)
        ref_r = target.reshape(g, tb, n)

        kernel = functools.partial(_tversky_kernel_flat,
                                   n_valid=n,
                                   chunk_elems=chunk_elems,
                                   need_mask=need_mask)
        in_spec = pl.BlockSpec((1, tb, chunk_elems), lambda i, j: (i, 0, j))
        acc_shape = pltpu.VMEM((3, tb, 1), jnp.float32)

    out = pl.pallas_call(
        kernel,
        out_shape=jax.ShapeDtypeStruct((g, tb, 128), jnp.float32),
        grid=(g, n_chunks),
        in_specs=[in_spec, in_spec],
        out_specs=pl.BlockSpec((1, tb, 128), lambda i, j: (i, 0, 0)),
        scratch_shapes=[acc_shape],
        compiler_params=pltpu.CompilerParams(
            dimension_semantics=("parallel", "arbitrary"),
        ),
    )(prob_r, ref_r)

    per_sample = out[:, :, 0].reshape(b)   # (B,) = 1 - tversky_i
    return jnp.mean(per_sample)


def _reference_loss(prob, target):
    """Pure-JAX mirror of the PyTorch per-sample loop."""
    b = prob.shape[0]
    total = 0.0
    for i in range(b):
        p = prob[i].astype(jnp.float32)
        r = target[i].astype(jnp.float32)
        tp = jnp.sum(r * p)
        fp = jnp.sum((1.0 - r) * p)
        fn = jnp.sum(r * (1.0 - p))
        total = total + (1.0 - tp / (tp + ALPHA * fp + BETA * fn))
    return total / b


if __name__ == "__main__":
    keys = jax.random.split(jax.random.PRNGKey(0), 6)

    cases = [
        # (shape, block_bytes): exercise all code paths at small sizes.
        ((2, 4, 16, 16), 2 << 20),   # aligned, single chunk (default blocks)
        ((2, 4, 36, 32), 2048),      # aligned, multi-chunk + masked tail chunk
        ((2, 3, 20, 20), 2048),      # C*H*W % 128 != 0: flat path + masked tail
    ]

    for idx, (shape, blk) in enumerate(cases):
        k1, k2 = keys[2 * idx], keys[2 * idx + 1]
        logits = jax.random.normal(k1, shape, dtype=jnp.float32)
        prob = jax.nn.sigmoid(logits)                       # probabilities in (0,1)
        target = (jax.random.uniform(k2, shape) > 0.5).astype(jnp.float32)

        outputs = (prob,)                                   # module indexes outputs[0]
        loss = jax.block_until_ready(tversky_loss(outputs, target, block_bytes=blk))
        ref = _reference_loss(prob, target)
        assert abs(float(loss) - float(ref)) < 1e-5, (shape, float(loss), float(ref))

    print("KERNEL_OK")
</pallas_src>

<mosaic_0001>
module attributes {stable_mosaic.version = 11 : i64} {
  func.func @_tversky_kernel_aligned(%arg0: i32, %arg1: i32, %arg2: memref<1x1x8x128xf32, #tpu.memory_space<vmem>>, %arg3: memref<1x1x8x128xf32, #tpu.memory_space<vmem>>, %arg4: memref<1x1x128xf32, #tpu.memory_space<vmem>>, %arg5: memref<3x1x128xf32, #tpu.memory_space<vmem>>) attributes {dimension_semantics = [#tpu.dimension_semantics<parallel>, #tpu.dimension_semantics<arbitrary>], iteration_bounds = array<i64: 2, 1>, scalar_prefetch = 0 : i64, scratch_operands = 1 : i64, tpu.core_type = #tpu.core_type<tc>, window_params = [{transform_indices = @transform_0, window_bounds = array<i64: 1, 1, 8, 128>}, {transform_indices = @transform_1, window_bounds = array<i64: 1, 1, 8, 128>}, {transform_indices = @transform_2, window_bounds = array<i64: 1, 1, 128>}]} {
    %c0_i32 = arith.constant 0 : i32
    %0 = arith.cmpi eq, %arg1, %c0_i32 : i32
    %1 = arith.extui %0 : i1 to i32
    %c0_i32_0 = arith.constant 0 : i32
    %2 = arith.cmpi ne, %1, %c0_i32_0 : i32
    scf.if %2 {
      %cst_28 = arith.constant 0.000000e+00 : f32
      %32 = vector.broadcast %cst_28 : f32 to vector<3x1x128xf32>
      %c0_29 = arith.constant 0 : index
      %c0_30 = arith.constant 0 : index
      %c0_31 = arith.constant 0 : index
      %33 = vector.load %arg5[%c0_29, %c0_30, %c0_31] : memref<3x1x128xf32, #tpu.memory_space<vmem>>, vector<3x1x128xf32>
      tpu.vector_store %arg5[%c0_29, %c0_30, %c0_31], %32 {strides = array<i32>} : memref<3x1x128xf32, #tpu.memory_space<vmem>>, vector<3x1x128xf32>,
    } else {
    }
    %c0 = arith.constant 0 : index
    %c0_1 = arith.constant 0 : index
    %c0_2 = arith.constant 0 : index
    %c0_3 = arith.constant 0 : index
    %3 = vector.load %arg2[%c0, %c0_1, %c0_2, %c0_3] : memref<1x1x8x128xf32, #tpu.memory_space<vmem>>, vector<1x1x8x128xf32>
    %4 = vector.shape_cast %3 : vector<1x1x8x128xf32> to vector<1x8x128xf32>
    %c0_4 = arith.constant 0 : index
    %c0_5 = arith.constant 0 : index
    %c0_6 = arith.constant 0 : index
    %c0_7 = arith.constant 0 : index
    %5 = vector.load %arg3[%c0_4, %c0_5, %c0_6, %c0_7] : memref<1x1x8x128xf32, #tpu.memory_space<vmem>>, vector<1x1x8x128xf32>
    %6 = vector.shape_cast %5 : vector<1x1x8x128xf32> to vector<1x8x128xf32>
    %c0_8 = arith.constant 0 : index
    %c0_9 = arith.constant 0 : index
    %c0_10 = arith.constant 0 : index
    %7 = vector.load %arg5[%c0_8, %c0_9, %c0_10] : memref<3x1x128xf32, #tpu.memory_space<vmem>>, vector<1x1x128xf32>
    %8 = vector.shape_cast %7 : vector<1x1x128xf32> to vector<1x128xf32>
    %9 = arith.mulf %6, %4 : vector<1x8x128xf32>
    %cst = arith.constant dense<0.000000e+00> : vector<1x128xf32>
    %10 = vector.multi_reduction <add>, %9, %cst [1] : vector<1x8x128xf32> to vector<1x128xf32>
    %11 = arith.addf %8, %10 : vector<1x128xf32>
    %c0_11 = arith.constant 0 : index
    %c0_12 = arith.constant 0 : index
    %c0_13 = arith.constant 0 : index
    %12 = vector.load %arg5[%c0_11, %c0_12, %c0_13] : memref<3x1x128xf32, #tpu.memory_space<vmem>>, vector<1x1x128xf32>
    %13 = vector.shape_cast %12 : vector<1x1x128xf32> to vector<1x128xf32>
    %14 = vector.shape_cast %11 : vector<1x128xf32> to vector<1x1x128xf32>
    tpu.vector_store %arg5[%c0_11, %c0_12, %c0_13], %14 {strides = array<i32>} : memref<3x1x128xf32, #tpu.memory_space<vmem>>, vector<1x1x128xf32>,
    %c1 = arith.constant 1 : index
    %c0_14 = arith.constant 0 : index
    %c0_15 = arith.constant 0 : index
    %15 = vector.load %arg5[%c1, %c0_14, %c0_15] : memref<3x1x128xf32, #tpu.memory_space<vmem>>, vector<1x1x128xf32>
    %16 = vector.shape_cast %15 : vector<1x1x128xf32> to vector<1x128xf32>
    %cst_16 = arith.constant dense<0.000000e+00> : vector<1x128xf32>
    %17 = vector.multi_reduction <add>, %4, %cst_16 [1] : vector<1x8x128xf32> to vector<1x128xf32>
    %18 = arith.addf %16, %17 : vector<1x128xf32>
    %c1_17 = arith.constant 1 : index
    %c0_18 = arith.constant 0 : index
    %c0_19 = arith.constant 0 : index
    %19 = vector.load %arg5[%c1_17, %c0_18, %c0_19] : memref<3x1x128xf32, #tpu.memory_space<vmem>>, vector<1x1x128xf32>
    %20 = vector.shape_cast %19 : vector<1x1x128xf32> to vector<1x128xf32>
    %21 = vector.shape_cast %18 : vector<1x128xf32> to vector<1x1x128xf32>
    tpu.vector_store %arg5[%c1_17, %c0_18, %c0_19], %21 {strides = array<i32>} : memref<3x1x128xf32, #tpu.memory_space<vmem>>, vector<1x1x128xf32>,
    %c2 = arith.constant 2 : index
    %c0_20 = arith.constant 0 : index
    %c0_21 = arith.constant 0 : index
    %22 = vector.load %arg5[%c2, %c0_20, %c0_21] : memref<3x1x128xf32, #tpu.memory_space<vmem>>, vector<1x1x128xf32>
    %23 = vector.shape_cast %22 : vector<1x1x128xf32> to vector<1x128xf32>
    %cst_22 = arith.constant dense<0.000000e+00> : vector<1x128xf32>
    %24 = vector.multi_reduction <add>, %6, %cst_22 [1] : vector<1x8x128xf32> to vector<1x128xf32>
    %25 = arith.addf %23, %24 : vector<1x128xf32>
    %c2_23 = arith.constant 2 : index
    %c0_24 = arith.constant 0 : index
    %c0_25 = arith.constant 0 : index
    %26 = vector.load %arg5[%c2_23, %c0_24, %c0_25] : memref<3x1x128xf32, #tpu.memory_space<vmem>>, vector<1x1x128xf32>
    %27 = vector.shape_cast %26 : vector<1x1x128xf32> to vector<1x128xf32>
    %28 = vector.shape_cast %25 : vector<1x128xf32> to vector<1x1x128xf32>
    tpu.vector_store %arg5[%c2_23, %c0_24, %c0_25], %28 {strides = array<i32>} : memref<3x1x128xf32, #tpu.memory_space<vmem>>, vector<1x1x128xf32>,
    %c0_i32_26 = arith.constant 0 : i32
    %29 = arith.cmpi eq, %arg1, %c0_i32_26 : i32
    %30 = arith.extui %29 : i1 to i32
    %c0_i32_27 = arith.constant 0 : i32
    %31 = arith.cmpi ne, %30, %c0_i32_27 : i32
    scf.if %31 {
      %c0_28 = arith.constant 0 : index
      %c0_29 = arith.constant 0 : index
      %c0_30 = arith.constant 0 : index
      %32 = vector.load %arg5[%c0_28, %c0_29, %c0_30] : memref<3x1x128xf32, #tpu.memory_space<vmem>>, vector<1x1x128xf32>
      %33 = vector.shape_cast %32 : vector<1x1x128xf32> to vector<1x128xf32>
      %cst_31 = arith.constant dense<0.000000e+00> : vector<1xf32>
      %34 = vector.multi_reduction <add>, %33, %cst_31 [1] : vector<1x128xf32> to vector<1xf32>
      %35 = vector.shape_cast %34 : vector<1xf32> to vector<1x1xf32>
      %c1_32 = arith.constant 1 : index
      %c0_33 = arith.constant 0 : index
      %c0_34 = arith.constant 0 : index
      %36 = vector.load %arg5[%c1_32, %c0_33, %c0_34] : memref<3x1x128xf32, #tpu.memory_space<vmem>>, vector<1x1x128xf32>
      %37 = vector.shape_cast %36 : vector<1x1x128xf32> to vector<1x128xf32>
      %cst_35 = arith.constant dense<0.000000e+00> : vector<1xf32>
      %38 = vector.multi_reduction <add>, %37, %cst_35 [1] : vector<1x128xf32> to vector<1xf32>
      %39 = vector.shape_cast %38 : vector<1xf32> to vector<1x1xf32>
      %c2_36 = arith.constant 2 : index
      %c0_37 = arith.constant 0 : index
      %c0_38 = arith.constant 0 : index
      %40 = vector.load %arg5[%c2_36, %c0_37, %c0_38] : memref<3x1x128xf32, #tpu.memory_space<vmem>>, vector<1x1x128xf32>
      %41 = vector.shape_cast %40 : vector<1x1x128xf32> to vector<1x128xf32>
      %cst_39 = arith.constant dense<0.000000e+00> : vector<1xf32>
      %42 = vector.multi_reduction <add>, %41, %cst_39 [1] : vector<1x128xf32> to vector<1xf32>
      %43 = vector.shape_cast %42 : vector<1xf32> to vector<1x1xf32>
      %44 = arith.subf %39, %35 : vector<1x1xf32>
      %45 = arith.subf %43, %35 : vector<1x1xf32>
      %cst_40 = arith.constant 3.000000e-01 : f32
      %46 = vector.broadcast %cst_40 : f32 to vector<1x1xf32>
      %47 = arith.mulf %46, %44 : vector<1x1xf32>
      %48 = arith.addf %35, %47 : vector<1x1xf32>
      %cst_41 = arith.constant 0.699999988 : f32
      %49 = vector.broadcast %cst_41 : f32 to vector<1x1xf32>
      %50 = arith.mulf %49, %45 : vector<1x1xf32>
      %51 = arith.addf %48, %50 : vector<1x1xf32>
      %52 = arith.divf %35, %51 : vector<1x1xf32>
      %cst_42 = arith.constant 1.000000e+00 : f32
      %53 = vector.broadcast %cst_42 : f32 to vector<1x1xf32>
      %54 = arith.subf %53, %52 : vector<1x1xf32>
      %55 = vector.shape_cast %54 : vector<1x1xf32> to vector<1x1xf32>
      %56 = vector.broadcast %55 : vector<1x1xf32> to vector<1x128xf32>
      %c0_43 = arith.constant 0 : index
      %c0_44 = arith.constant 0 : index
      %c0_45 = arith.constant 0 : index
      %57 = vector.load %arg4[%c0_43, %c0_44, %c0_45] : memref<1x1x128xf32, #tpu.memory_space<vmem>>, vector<1x1x128xf32>
      %58 = vector.shape_cast %57 : vector<1x1x128xf32> to vector<1x128xf32>
      %59 = vector.shape_cast %56 : vector<1x128xf32> to vector<1x1x128xf32>
      tpu.vector_store %arg4[%c0_43, %c0_44, %c0_45], %59 {strides = array<i32>} : memref<1x1x128xf32, #tpu.memory_space<vmem>>, vector<1x1x128xf32>,
    } else {
    }
    return
  }
  func.func @transform_0(%arg0: i32, %arg1: i32) -> (i32, i32, i32, i32) {
    %c0_i32 = arith.constant 0 : i32
    %c0_i32_0 = arith.constant 0 : i32
    %c0_i32_1 = arith.constant 0 : i32
    return %arg0, %c0_i32, %arg1, %c0_i32_0 : i32, i32, i32, i32
  }
  func.func @transform_1(%arg0: i32, %arg1: i32) -> (i32, i32, i32, i32) {
    %c0_i32 = arith.constant 0 : i32
    %c0_i32_0 = arith.constant 0 : i32
    %c0_i32_1 = arith.constant 0 : i32
    return %arg0, %c0_i32, %arg1, %c0_i32_0 : i32, i32, i32, i32
  }
  func.func @transform_2(%arg0: i32, %arg1: i32) -> (i32, i32, i32) {
    %c0_i32 = arith.constant 0 : i32
    %c0_i32_0 = arith.constant 0 : i32
    %c0_i32_1 = arith.constant 0 : i32
    return %arg0, %c0_i32, %c0_i32_0 : i32, i32, i32
  }
}

</mosaic_0001>

<bundles_post_ra>
// kernel: tpu_custom_call.1
= control target key start
LH: loop header
LB: loop body
LE: loop exit
PB: predicated region body
PF: predicated region fallthrough
CT: control target
= control target key end

     0   :  { %7 = vsyncpa [#allocation4], 0  ;;  %s862_s0 = inlined_call_operand.hbm [shape: f32[2,1,8,128], index: 0, kind: input, shape index: {}]   ;;  %s863_s1 = inlined_call_operand.hbm [shape: f32[2,1,8,128], index: 1, kind: input, shape index: {}]   ;;  %s864_s2 = inlined_call_operand.hbm [shape: f32[2,1,128], index: 2, kind: output, shape index: {}]  }
   0x1   :  { %9 = vsyncpa [#allocation4 + $0x1], 0 }
   0x2   :  { %10 = vsyncpa [#allocation7], 0 }
   0x3   :  { %12 = vsyncpa [#allocation7 + $0x1], 0 }
   0x4   :  { %13 = vsyncpa [#allocation5], 0 }
   0x5   :  { %15 = vsyncpa [#allocation5 + $0x1], 0  ;;  %s641_s9 = smov 0   ;;  %s643_s10 = smov 0  }
   0x6   :  { %s645_s11 = smov 0   ;;  %s647_s12 = smov 0  }
   0x7   :  { %s649_s13 = smov 0   ;;  %s651_s14 = smov 0  }
   0x8 LB: > { %s390_s15 = sadd.s32 4294967295, %s620_s14   ;;  %s391_s16 = sadd.s32 4294967294, %s620_s14   ;;  %s620_s14 = sphi %s651_s14, %s21_s14   ;;  %s616_s13 = sphi %s649_s13, %s884_s13   ;;  %s612_s12 = sphi %s647_s12, %s883_s12   ;;  %s608_s11 = sphi %s645_s11, %s882_s11   ;;  %s604_s10 = sphi %s643_s10, %s881_s10   ;;  %s600_s9 = sphi %s641_s9, %s880_s9  }
   0x9   : > { %s33_s17 = sadd.s32 1, %s616_s13  ;;  %s42_s18 = sadd.s32 1, %s608_s11 }
   0xa   : > { %p35_p0 = scmp.ge.s32.totalorder %s33_s17, 2  ;;  %p49_p1 = scmp.ne.s32.totalorder %s608_s11, %s604_s10 }
   0xb   : > { %p50_p2 = scmp.eq.s32.totalorder %s620_s14, 0  ;;  %p55_p3 = scmp.ne.s32.totalorder %s604_s10, %s600_s9 }
   0xc   : > { %s886_s17 = smov (%p35_p0, %s33_s17), 0  ;;  %p56_p5 = scmp.eq.s32.totalorder %s390_s15, 0 }
   0xd   : > { %p682_p4 = por %p50_p2, %p49_p1  ;;  %s37_s20 = ssub.s32 %s616_s13, %s886_s17 }
   0xe   : > { %p107_p6 = scmp.eq.s32.totalorder %s390_s15, 1  ;;  %p40_p7 = scmp.eq.s32.totalorder %s37_s20, 0 }
   0xf   : > { %p688_p8 = por %p56_p5, %p55_p3  ;;  %p113_p10 = scmp.eq.s32.totalorder %s391_s16, 1 }
  0x10   : > { %p692_p9 = por %p107_p6, %p49_p1  ;;  %p421_p13 = scmp.lt.s32.totalorder %s620_s14, 2 }
  0x11   : > { %s868_s21 = scalar_select %p688_p8, 1, 0 }
  0x12   : > { %s869_s22 = scalar_select %p692_p9, 1, 0 }
  0x13   : > { %s697_s23 = scalar_select %p40_p7, %s608_s11, %s42_s18  }
  0x14   : > { %p699_p11 = por %p113_p10, %p55_p3  ;;  %s706_s25 = sand.u32 1, %s608_s11  }
  0x15   : > { %s394_s26 = sshll.u32 %s706_s25, 3  ;;  %s395_s27 = sshll.u32 %s616_s13, 7 }
  0x16   : > { %s870_s24 = scalar_select %p699_p11, 1, 0 }
  0x17   : > { %s715_s30 = scalar_lea.hbm %s862_s0, %s395_s27  ;;  %s137_s3 = scalar_lea.vmem [#allocation3], %s394_s26 }
  0x18   : > { %s145_s4 = sshll.u32 %s137_s3, 4  ;;  %p723_p0 = pnand %p421_p13, %p682_p4  ;;  %s719_s4 = int_to_ptr.vmem [resolvable:$true] %s145_s4 }
  0x19   : > { %s134_s6 = scalar_lea.sflag [#allocation4], %s706_s25  ;;  %s474_s7 = scalar_lea.hbm %s715_s30, 128 }
  0x1a   : > { %p475_p3 = scmp.ne.s32.totalorder %s715_s30, %s474_s7  ;;  %p476_p5 = pneg %p723_p0 }
  0x1b   : > { %s479_s16 = scalar_lea.hbm %s862_s0, 256  ;;  %p480_p4 = scmp.lt.u32.totalorder %s715_s30, %s862_s0 }
  0x1c   : > { %p477_p6 = pnand %p476_p5, %p475_p3  ;;  %p481_p10 = scmp.lt.u32.totalorder %s479_s16, %s474_s7 }
  0x1d   : > { %p483_p12 = scmp.lt.u32.totalorder %s474_s7, %s715_s30 }
  0x1e   : > { %p478_p7 = pneg %p477_p6  ;;  %p482_p13 = por %p481_p10, %p480_p4 }
  0x20   : > { %p484_p1 = por %p483_p12, %p482_p13 }
  0x22   : > { %p485_p2 = pnand %p484_p1, %p478_p7 }
  0x24   : > { %488 = shalt.err (!%p485_p2)
}
  0x25   : > { %s489_s20 = scalar_lea.vmem %s719_s4, 128  ;;  %s622_s28 = smov [#allocation3]  }
  0x26   : > { %p490_p3 = scmp.ne.s32.totalorder %s719_s4, %s489_s20  ;;  %s494_s29 = sshll.u32 %s622_s28, 4  ;;  %s495_s29 = int_to_ptr.vmem [resolvable:$false] %s494_s29 }
  0x27   : > { %s496_s3 = scalar_lea.vmem %s495_s29, 256  ;;  %p497_p9 = scmp.lt.s32.totalorder %s719_s4, %s495_s29 }
  0x28   : > { %p492_p6 = pnand %p490_p3, %p476_p5  ;;  %p498_p4 = scmp.lt.s32.totalorder %s496_s3, %s489_s20 }
  0x2a   : > { %p493_p11 = pneg %p492_p6  ;;  %p499_p10 = por %p498_p4, %p497_p9 }
  0x2c   : > { %p500_p12 = pnand %p499_p10, %p493_p11 }
  0x2e   : > { %503 = shalt.err (!%p500_p12)
}
  0x2f   : > { %413 = dma.hbm_to_vmem [thread:$0]  (!%p723_p0), %s715_s30, 128, %s719_s4, %s134_s6  }
  0x30   : > { %p872_p1 = scmp.lt.s32.totalorder %s620_s14, 3  ;;  %p873_p2 = scmp.ge.s32.totalorder %s620_s14, 1 }
  0x31   : > { %s768_s16 = scalar_lea.hbm %s863_s1, %s395_s27  ;;  %s156_s18 = scalar_lea.vmem [#allocation6], %s394_s26 }
  0x32   : > { %p759_p7 = pnand %p873_p2, %p872_p1  ;;  %s164_s19 = sshll.u32 %s156_s18, 4  ;;  %s165_s19 = int_to_ptr.vmem [resolvable:$true] %s164_s19 }
  0x33   : > { %s153_s30 = scalar_lea.sflag [#allocation7], %s706_s25  ;;  %s504_s4 = scalar_lea.hbm %s768_s16, 128 }
  0x34   : > { %s874_s7 = scalar_select %p759_p7, 1, 0 }
  0x35   : > { %p505_p9 = scmp.ne.s32.totalorder %s768_s16, %s504_s4  ;;  %s509_s27 = scalar_lea.hbm %s863_s1, 256 }
  0x36   : > { %p510_p3 = scmp.lt.u32.totalorder %s768_s16, %s863_s1  ;;  %p511_p6 = scmp.lt.u32.totalorder %s509_s27, %s504_s4 }
  0x37   : > { %p507_p11 = pnand %p505_p9, %p476_p5  ;;  %p513_p10 = scmp.lt.u32.totalorder %s504_s4, %s768_s16 }
  0x38   : > { %p512_p4 = por %p511_p6, %p510_p3 }
  0x39   : > { %p508_p13 = pneg %p507_p11 }
  0x3a   : > { %p514_p12 = por %p513_p10, %p512_p4 }
  0x3c   : > { %p515_p1 = pnand %p514_p12, %p508_p13 }
  0x3e   : > { %518 = shalt.err (!%p515_p1)
}
  0x3f   : > { %s519_s25 = scalar_lea.vmem %s165_s19, 128  ;;  %s623_s26 = smov [#allocation6]  }
  0x40   : > { %p520_p2 = scmp.ne.s32.totalorder %s165_s19, %s519_s25  ;;  %s524_s3 = sshll.u32 %s623_s26, 4  ;;  %s525_s3 = int_to_ptr.vmem [resolvable:$false] %s524_s3 }
  0x41   : > { %s526_s8 = scalar_lea.vmem %s525_s3, 256  ;;  %p527_p8 = scmp.lt.s32.totalorder %s165_s19, %s525_s3 }
  0x42   : > { %p522_p9 = pnand %p520_p2, %p476_p5  ;;  %p528_p7 = scmp.lt.s32.totalorder %s526_s8, %s519_s25 }
  0x44   : > { %p523_p11 = pneg %p522_p9  ;;  %p529_p3 = por %p528_p7, %p527_p8 }
  0x46   : > { %p530_p6 = pnand %p529_p3, %p523_p11 }
  0x48   : > { %533 = shalt.err (!%p530_p6)
}
  0x49   : > { %416 = dma.hbm_to_vmem [thread:$0]  (!%p723_p0), %s768_s16, 128, %s165_s19, %s153_s30  }
  0x4a   : > { %p875_p13 = scmp.ne.s32.totalorder %s874_s7, 0 }
  0x4b   : > { %s795_s15 = sand.u32 (!%p875_p13), 1, %s604_s10   ;;  %p876_p5 = scmp.ne.s32.totalorder (!%p875_p13), %s868_s21, 0 }
  0x4c   : > { %173 = sbr.rel (%p875_p13) target bundleno = 295 (0x127), region = 28  ;;  %s399_s18 = sshll.u32 (!%p875_p13), %s795_s15, 3 }
  0x4d   : > { %s176_s4 = scalar_lea.sflag (!%p875_p13), [#allocation4], %s795_s15  ;;  %s179_s6 = scalar_lea.vmem (!%p875_p13), [#allocation3], %s399_s18 }
  0x53   : > { %587 = dma.done.wait (%p876_p5), %s176_s4, 128  }
  0x54   : > { %589 = vsyncadd (%p876_p5), %s176_s4, 4294967168  ;;  %s185_s5 = scalar_lea.sflag [#allocation7], %s795_s15  ;;  %s188_s16 = scalar_lea.vmem [#allocation6], %s399_s18 }
  0x55   : > { %591 = dma.done.wait (%p876_p5), %s185_s5, 128  }
  0x56   : > { %593 = vsyncadd (%p876_p5), %s185_s5, 4294967168  ;;  %v624_v0 = vmov 0.0   ;;  %v221_v1 = vld [vmem:[%s188_s16] sm:$0xff]  ;;  %v220_v2 = vld [vmem:[%s179_s6] sm:$0xff]  ;;  %vm256_vm0 = vcmask 1040384   ;;  %s401_s21 = sshll.u32 %s612_s12, 4 }
  0x57   : > { %219 = vst [vmem:[#allocation2 + $0x2] sm:$0x1] %v624_v0  ;;  %217 = vst [vmem:[#allocation2] sm:$0x1] %v624_v0  ;;  %v244_v3 = vrot.slane %v221_v1, 4  ;;  %v223_v4 = vmul.f32 %v221_v1, %v220_v2  ;;  %v234_v5 = vrot.slane %v220_v2, 4  ;;  %s813_s27 = scalar_lea.hbm %s864_s2, %s401_s21 }
  0x58   : > { %218 = vst [vmem:[#allocation2 + $0x1] sm:$0x1] %v624_v0  ;;  %s212_s7 = scalar_lea.vmem [#allocation8], %s795_s15  ;;  %s279_s28 = scalar_lea.sflag [#allocation5], %s795_s15 }
  0x59   : > { %v245_v6 = vadd.f32 %v244_v3, %v221_v1  ;;  %v224_v7 = vrot.slane %v223_v4, 4  ;;  %v235_v8 = vadd.f32 %v234_v5, %v220_v2  ;;  %s291_s19 = sshll.u32 %s212_s7, 4  ;;  %p877_p0 = scmp.ne.s32.totalorder %s869_s22, 0  ;;  %s815_s19 = int_to_ptr.vmem [resolvable:$true] %s291_s19 }
  0x5a   : > { %s534_s29 = scalar_lea.vmem %s815_s19, 16  ;;  %s625_s12 = smov [#allocation8]  }
  0x5b   : > { %v246_v9 = vrot.slane %v245_v6, 2  ;;  %v225_v10 = vadd.f32 %v224_v7, %v223_v4  ;;  %v236_v11 = vrot.slane %v235_v8, 2  ;;  %p535_p8 = scmp.ne.s32.totalorder %s815_s19, %s534_s29  ;;  %s538_s25 = sshll.u32 %s625_s12, 4  ;;  %s539_s25 = int_to_ptr.vmem [resolvable:$false] %s538_s25 }
  0x5c   : > { %s540_s26 = scalar_lea.vmem %s539_s25, 32  ;;  %p541_p10 = scmp.lt.s32.totalorder %s815_s19, %s539_s25 }
  0x5d   : > { %v247_v12 = vadd.f32 %v246_v9, %v245_v6  ;;  %v226_v13 = vrot.slane %v225_v10, 2  ;;  %v237_v14 = vadd.f32 %v236_v11, %v235_v8  ;;  %p536_p7 = pnand %p535_p8, %p877_p0  ;;  %p542_p12 = scmp.lt.s32.totalorder %s540_s26, %s534_s29 }
  0x5e   : > { %v243_v18 = vld [vmem:[#allocation2 + $0x2] sm:$0x1]  ;;  %v222_v23 = vld [vmem:[#allocation2] sm:$0x1] }
  0x5f   : > { %v248_v15 = vrot.slane %v247_v12, 1  ;;  %v227_v16 = vadd.f32 %v226_v13, %v225_v10  ;;  %v238_v17 = vrot.slane %v237_v14, 1  ;;  %v233_v19 = vld [vmem:[#allocation2 + $0x1] sm:$0x1]  ;;  %p537_p4 = pneg %p536_p7  ;;  %p543_p1 = por %p542_p12, %p541_p10 }
  0x61   : > { %v249_v20 = vadd.f32 %v248_v15, %v247_v12  ;;  %v228_v21 = vrot.slane %v227_v16, 1  ;;  %v239_v22 = vadd.f32 %v238_v17, %v237_v14  ;;  %p544_p2 = pnand %p543_p1, %p537_p4 }
  0x63   : > { %v250_v24 = vadd.f32 %v249_v20, %v243_v18  ;;  %v229_v25 = vadd.f32 %v228_v21, %v227_v16  ;;  %v240_v26 = vadd.f32 %v239_v22, %v233_v19 }
  0x65   : > { %251 = vst [vmem:[#allocation2 + $0x2] sm:$0x1] %v250_v24  ;;  %v230_v27 = vadd.f32 %v229_v25, %v222_v23  ;;  %241 = vst [vmem:[#allocation2 + $0x1] sm:$0x1] %v240_v26 }
  0x67   : > { %231 = vst [vmem:[#allocation2] sm:$0x1] %v230_v27 }
  0x6c   : > { %v264_v28 = vld [vmem:[#allocation2 + $0x2] sm:$0x1]  ;;  %v260_v31 = vld [vmem:[#allocation2 + $0x1] sm:$0x1] }
  0x6d   : > { %v265_v29 = vsel %vm256_vm0, %v264_v28, 0.0  ;;  %v261_v33 = vsel %vm256_vm0, %v260_v31, 0.0 }
  0x6e   : > { %266 = vadd.xlane.f32.xlu1 %v265_v29  ;;  %v255_v30 = vld [vmem:[#allocation2] sm:$0x1] }
  0x6f   : > { %v257_v32 = vsel %vm256_vm0, %v255_v30, 0.0 }
  0x70   : > { %258 = vadd.xlane.f32.xlu0 %v257_v32 }
  0x74   : > { %262 = vadd.xlane.f32.xlu0 %v261_v33 }
  0xfb   : > { %v267_v35 = vpop.xlane.xlu1 %266 }
  0xfd   : > { %v259_v34 = vpop.xlane.xlu0 %258 }
  0xfe   : > { %v269_v37 = vsub.f32 %v267_v35, %v259_v34 }
 0x100   : > { %v272_v40 = vmul.f32 0.7, %v269_v37 }
 0x101   : > { %v263_v36 = vpop.xlane.xlu0 %262 }
 0x102   : > { %v268_v38 = vsub.f32 %v263_v36, %v259_v34 }
 0x104   : > { %v270_v39 = vmul.f32 0.3, %v268_v38 }
 0x106   : > { %v271_v41 = vadd.f32 %v270_v39, %v259_v34 }
 0x108   : > { %v273_v42 = vadd.f32 %v272_v40, %v271_v41 }
 0x10a   : > { %472 = vrcp.f32 %v273_v42 }
 0x114   : > { %v473_v43 = vpop.eup %472 }
 0x115   : > { %v275_v44 = vmul.f32 %v473_v43, %v259_v34 }
 0x117   : > { %v276_v45 = vsub.f32 1.0, %v275_v44 }
 0x119   : > { %277 = vst [vmem:[%s212_s7] sm:$0x1] %v276_v45 }
 0x11a   : > { %547 = shalt.err (!%p544_p2)
}
 0x11b   : > { %s548_s3 = scalar_lea.hbm %s813_s27, 16  ;;  %s552_s18 = scalar_lea.hbm %s864_s2, 32 }
 0x11c   : > { %p549_p9 = scmp.ne.s32.totalorder %s813_s27, %s548_s3  ;;  %p553_p6 = scmp.lt.u32.totalorder %s813_s27, %s864_s2 }
 0x11d   : > { %p554_p13 = scmp.lt.u32.totalorder %s552_s18, %s548_s3  ;;  %p556_p8 = scmp.lt.u32.totalorder %s548_s3, %s813_s27 }
 0x11e   : > { %p550_p11 = pnand %p549_p9, %p877_p0 }
 0x11f   : > { %p555_p5 = por %p554_p13, %p553_p6 }
 0x120   : > { %p551_p3 = pneg %p550_p11 }
 0x121   : > { %p557_p7 = por %p556_p8, %p555_p5 }
 0x123   : > { %p558_p4 = pnand %p557_p7, %p551_p3 }
 0x125   : > { %561 = shalt.err (!%p558_p4)
}
 0x126   : > { %408 = dma.vmem_to_hbm [thread:$0]  (%p877_p0), %s815_s19, 16, %s813_s27, %s279_s28  }
 0x127 PF: > { %s303_s5 = sand.u32 1, %s600_s9   ;;  %p878_p10 = scmp.ne.s32.totalorder %s870_s24, 0 }
 0x128   : > { %p879_p12 = scmp.ge.s32.totalorder %s620_s14, 2  ;;  %s304_s16 = scalar_lea.sflag [#allocation5], %s303_s5 }
 0x12a   : > { %p418_p1 = pnand %p879_p12, %p878_p10 }
 0x12c   : > { %595 = dma.done.wait (!%p418_p1), %s304_s16, 16  }
 0x12d   : > { %597 = vsyncadd (!%p418_p1), %s304_s16, 4294967280  ;;  %s21_s14 = sadd.s32 1, %s620_s14   ;;  %s880_s9 = smov %s604_s10 }
 0x12e   : > { %p18_p2 = scmp.ge.s32.totalorder %s21_s14, 4   ;;  %s881_s10 = smov %s608_s11 }
 0x12f   : > { %s882_s11 = smov %s697_s23  ;;  %s883_s12 = smov %s616_s13 }
 0x130   : > { %s884_s13 = smov %s886_s17  ;;  %20 = sbr.rel (!%p18_p2) target bundleno = 8 (0x8), region = 96 }
 0x137   :  { %308 = vsyncpa [#allocation4], 1 }
 0x138   :  { %310 = vsyncpa [#allocation4 + $0x1], 1 }
 0x139   :  { %311 = vsyncpa [#allocation7], 1 }
 0x13a   :  { %313 = vsyncpa [#allocation7 + $0x1], 1 }
 0x13b   :  { %314 = vsyncpa [#allocation5], 1 }
 0x13c   :  { %316 = vsyncpa [#allocation5 + $0x1], 1 }

</bundles_post_ra>
